<compile_context>
chip_gen: v6e
topology: v6e:2x2x1
jax: 0.10.0
libtpu: 0.0.40
codegen_flags: <defaults>
</compile_context>

<pallas_src>
import functools
import math

import numpy as np
import jax
import jax.numpy as jnp
from jax import lax
from jax.experimental import pallas as pl
from jax.experimental.pallas import tpu as pltpu

MAX_LEN = 2048  # matches length=2048 in the PyTorch module __init__


def positional_encoding(length, d_model):
    """Numpy port of the reference positional_encoding (same math)."""
    depth = d_model / 2
    positions = np.arange(length, dtype=np.float32)[:, None]
    depths = np.arange(depth, dtype=np.float32)[None, :]
    angle_rates = 1.0 / (10000.0 ** depths)
    angle_rads = positions * angle_rates
    pos_encoding = np.concatenate(
        [np.sin(angle_rads), np.cos(angle_rads)], axis=-1
    ).astype(np.float32)
    return pos_encoding  # (length, d_model)


def _pick_token_tile(L):
    for tl in (256, 128, 64, 32, 16, 8):
        if L % tl == 0:
            return tl
    return L  # tiny / odd L: single tile covering the whole sequence


def _pos_emb_kernel(ids_ref, emb_ref, pos_ref, out_ref, gather_ref,
                    *, scale, tl, seq_len):
    """One grid step = TL tokens of one batch row.

    ids_ref    : (B*L,) int32 in SMEM (scalar prefetch)
    emb_ref    : (V, D) f32, VMEM-resident (constant block index)
    pos_ref    : (TL, D) f32 positional-encoding tile (resident across batch)
    out_ref    : (TL, D) f32 output tile (leading batch dim squeezed away)
    gather_ref : (TL, D) f32 VMEM scratch for the gathered embedding rows
    """
    lt = pl.program_id(0)           # token-tile index
    b = pl.program_id(1)            # batch index (innermost)
    base = b * seq_len + lt * tl    # offset of this tile's ids in the flat id array

    # Batched gather: copy TL embedding rows from the resident table into scratch.
    def gather_row(i, carry):
        tok = ids_ref[base + i]                                   # cheap SMEM scalar read
        gather_ref[pl.ds(i, 1), :] = emb_ref[pl.ds(tok, 1), :]    # dynamic row copy in VMEM
        return carry

    lax.fori_loop(0, tl, gather_row, 0, unroll=(tl <= 16))

    # scale + positional add (VPU; memory-bound kernel so these are free)
    out_ref[...] = gather_ref[...] * scale + pos_ref[...]


def positional_embedding_forward(ids, emb_table, pos_enc, token_tile=None):
    """ids: (B, L) int32; emb_table: (V, D) f32; pos_enc: (MAX_LEN, D) f32 -> (B, L, D) f32."""
    B, L = ids.shape
    V, D = emb_table.shape
    assert L <= pos_enc.shape[0], "sequence longer than positional-encoding table"
    scale = math.sqrt(float(D))

    tl = token_tile if token_tile is not None else _pick_token_tile(L)
    assert L % tl == 0
    nt = L // tl

    grid_spec = pltpu.PrefetchScalarGridSpec(
        num_scalar_prefetch=1,          # flat token ids -> SMEM
        grid=(nt, B),                   # batch innermost: pos tile reused across batch
        in_specs=[
            # whole embedding table, constant block index -> loaded into VMEM once.
            # (For huge vocab / v7x use bf16 or a manual DMA-gather path instead.)
            pl.BlockSpec((V, D), lambda lt, b, ids_s: (0, 0)),
            # positional-encoding tile for this token tile (index independent of b).
            pl.BlockSpec((tl, D), lambda lt, b, ids_s: (lt, 0)),
        ],
        # squeezed leading batch dim: kernel sees (TL, D), no in-kernel reshape needed.
        # (last dim == full D so stores are lane-dense whenever d_model is a multiple of 128.)
        out_specs=pl.BlockSpec((None, tl, D), lambda lt, b, ids_s: (b, lt, 0)),
        scratch_shapes=[pltpu.VMEM((tl, D), jnp.float32)],
    )

    kernel = functools.partial(_pos_emb_kernel, scale=scale, tl=tl, seq_len=L)

    return pl.pallas_call(
        kernel,
        out_shape=jax.ShapeDtypeStruct((B, L, D), jnp.float32),
        grid_spec=grid_spec,
        compiler_params=pltpu.CompilerParams(
            dimension_semantics=("parallel", "parallel"),   # v7x: shard grid over both TCs
        ),
    )(ids.reshape(-1).astype(jnp.int32), emb_table, pos_enc)


if __name__ == "__main__":
    vocab_size = 64
    d_model = 32

    key = jax.random.PRNGKey(0)
    k_ids, k_emb, k_ids2 = jax.random.split(key, 3)

    # Deterministic synthetic parameters (nn.Embedding weight ~ N(0, 1)).
    emb_table = jax.random.normal(k_emb, (vocab_size, d_model), dtype=jnp.float32)
    pos_enc = jnp.asarray(positional_encoding(MAX_LEN, d_model))
    sqrt_d = math.sqrt(float(d_model))

    # Check 1: small shape (B=2, L=8), single token tile.
    B, L = 2, 8
    ids = jax.random.randint(k_ids, (B, L), 0, vocab_size, dtype=jnp.int32)
    out = jax.block_until_ready(positional_embedding_forward(ids, emb_table, pos_enc))
    ref = emb_table[ids] * sqrt_d + pos_enc[None, :L, :]
    np.testing.assert_allclose(np.asarray(out), np.asarray(ref), rtol=1e-6, atol=1e-6)

    # Check 2: multi-tile grid (nt=2) to exercise pos-tile residency across batch steps.
    B2, L2 = 2, 16
    ids2 = jax.random.randint(k_ids2, (B2, L2), 0, vocab_size, dtype=jnp.int32)
    out2 = jax.block_until_ready(
        positional_embedding_forward(ids2, emb_table, pos_enc, token_tile=8))
    ref2 = emb_table[ids2] * sqrt_d + pos_enc[None, :L2, :]
    np.testing.assert_allclose(np.asarray(out2), np.asarray(ref2), rtol=1e-6, atol=1e-6)

    print("KERNEL_OK")
</pallas_src>

<mosaic_0001>
module attributes {stable_mosaic.version = 11 : i64} {
  func.func @_pos_emb_kernel(%arg0: i32, %arg1: i32, %arg2: memref<16xi32, #tpu.memory_space<smem>>, %arg3: memref<64x32xf32, #tpu.memory_space<vmem>>, %arg4: memref<8x32xf32, #tpu.memory_space<vmem>>, %arg5: memref<1x8x32xf32, #tpu.memory_space<vmem>>, %arg6: memref<8x32xf32, #tpu.memory_space<vmem>>) attributes {dimension_semantics = [#tpu.dimension_semantics<parallel>, #tpu.dimension_semantics<parallel>], iteration_bounds = array<i64: 1, 2>, scalar_prefetch = 1 : i64, scratch_operands = 1 : i64, tpu.core_type = #tpu.core_type<tc>, window_params = [{pipeline_mode = #tpu.pipeline_mode<synchronous>, transform_indices = @transform_0, window_bounds = array<i64: 64, 32>}, {transform_indices = @transform_1, window_bounds = array<i64: 8, 32>}, {transform_indices = @transform_2, window_bounds = array<i64: 1, 8, 32>}]} {
    %c8_i32 = arith.constant 8 : i32
    %0 = arith.muli %arg1, %c8_i32 : i32
    %c8_i32_0 = arith.constant 8 : i32
    %1 = arith.muli %arg0, %c8_i32_0 : i32
    %2 = arith.addi %0, %1 : i32
    %c0_i32 = arith.constant 0 : i32
    %3 = arith.addi %2, %c0_i32 : i32
    %4 = arith.index_cast %3 : i32 to index
    %5 = memref.load %arg2[%4] : memref<16xi32, #tpu.memory_space<smem>>
    %6 = arith.index_cast %5 : i32 to index
    %c0 = arith.constant 0 : index
    %7 = vector.load %arg3[%6, %c0] : memref<64x32xf32, #tpu.memory_space<vmem>>, vector<1x32xf32>
    %8 = arith.index_cast %c0_i32 : i32 to index
    %c0_1 = arith.constant 0 : index
    %9 = vector.load %arg6[%8, %c0_1] : memref<8x32xf32, #tpu.memory_space<vmem>>, vector<1x32xf32>
    tpu.vector_store %arg6[%8, %c0_1], %7 {strides = array<i32>} : memref<8x32xf32, #tpu.memory_space<vmem>>, vector<1x32xf32>,
    %c1_i32 = arith.constant 1 : i32
    %10 = arith.addi %2, %c1_i32 : i32
    %11 = arith.index_cast %10 : i32 to index
    %12 = memref.load %arg2[%11] : memref<16xi32, #tpu.memory_space<smem>>
    %13 = arith.index_cast %12 : i32 to index
    %c0_2 = arith.constant 0 : index
    %14 = vector.load %arg3[%13, %c0_2] : memref<64x32xf32, #tpu.memory_space<vmem>>, vector<1x32xf32>
    %15 = arith.index_cast %c1_i32 : i32 to index
    %c0_3 = arith.constant 0 : index
    %16 = vector.load %arg6[%15, %c0_3] : memref<8x32xf32, #tpu.memory_space<vmem>>, vector<1x32xf32>
    tpu.vector_store %arg6[%15, %c0_3], %14 {strides = array<i32>} : memref<8x32xf32, #tpu.memory_space<vmem>>, vector<1x32xf32>,
    %c2_i32 = arith.constant 2 : i32
    %17 = arith.addi %2, %c2_i32 : i32
    %18 = arith.index_cast %17 : i32 to index
    %19 = memref.load %arg2[%18] : memref<16xi32, #tpu.memory_space<smem>>
    %20 = arith.index_cast %19 : i32 to index
    %c0_4 = arith.constant 0 : index
    %21 = vector.load %arg3[%20, %c0_4] : memref<64x32xf32, #tpu.memory_space<vmem>>, vector<1x32xf32>
    %22 = arith.index_cast %c2_i32 : i32 to index
    %c0_5 = arith.constant 0 : index
    %23 = vector.load %arg6[%22, %c0_5] : memref<8x32xf32, #tpu.memory_space<vmem>>, vector<1x32xf32>
    tpu.vector_store %arg6[%22, %c0_5], %21 {strides = array<i32>} : memref<8x32xf32, #tpu.memory_space<vmem>>, vector<1x32xf32>,
    %c3_i32 = arith.constant 3 : i32
    %24 = arith.addi %2, %c3_i32 : i32
    %25 = arith.index_cast %24 : i32 to index
    %26 = memref.load %arg2[%25] : memref<16xi32, #tpu.memory_space<smem>>
    %27 = arith.index_cast %26 : i32 to index
    %c0_6 = arith.constant 0 : index
    %28 = vector.load %arg3[%27, %c0_6] : memref<64x32xf32, #tpu.memory_space<vmem>>, vector<1x32xf32>
    %29 = arith.index_cast %c3_i32 : i32 to index
    %c0_7 = arith.constant 0 : index
    %30 = vector.load %arg6[%29, %c0_7] : memref<8x32xf32, #tpu.memory_space<vmem>>, vector<1x32xf32>
    tpu.vector_store %arg6[%29, %c0_7], %28 {strides = array<i32>} : memref<8x32xf32, #tpu.memory_space<vmem>>, vector<1x32xf32>,
    %c4_i32 = arith.constant 4 : i32
    %31 = arith.addi %2, %c4_i32 : i32
    %32 = arith.index_cast %31 : i32 to index
    %33 = memref.load %arg2[%32] : memref<16xi32, #tpu.memory_space<smem>>
    %34 = arith.index_cast %33 : i32 to index
    %c0_8 = arith.constant 0 : index
    %35 = vector.load %arg3[%34, %c0_8] : memref<64x32xf32, #tpu.memory_space<vmem>>, vector<1x32xf32>
    %36 = arith.index_cast %c4_i32 : i32 to index
    %c0_9 = arith.constant 0 : index
    %37 = vector.load %arg6[%36, %c0_9] : memref<8x32xf32, #tpu.memory_space<vmem>>, vector<1x32xf32>
    tpu.vector_store %arg6[%36, %c0_9], %35 {strides = array<i32>} : memref<8x32xf32, #tpu.memory_space<vmem>>, vector<1x32xf32>,
    %c5_i32 = arith.constant 5 : i32
    %38 = arith.addi %2, %c5_i32 : i32
    %39 = arith.index_cast %38 : i32 to index
    %40 = memref.load %arg2[%39] : memref<16xi32, #tpu.memory_space<smem>>
    %41 = arith.index_cast %40 : i32 to index
    %c0_10 = arith.constant 0 : index
    %42 = vector.load %arg3[%41, %c0_10] : memref<64x32xf32, #tpu.memory_space<vmem>>, vector<1x32xf32>
    %43 = arith.index_cast %c5_i32 : i32 to index
    %c0_11 = arith.constant 0 : index
    %44 = vector.load %arg6[%43, %c0_11] : memref<8x32xf32, #tpu.memory_space<vmem>>, vector<1x32xf32>
    tpu.vector_store %arg6[%43, %c0_11], %42 {strides = array<i32>} : memref<8x32xf32, #tpu.memory_space<vmem>>, vector<1x32xf32>,
    %c6_i32 = arith.constant 6 : i32
    %45 = arith.addi %2, %c6_i32 : i32
    %46 = arith.index_cast %45 : i32 to index
    %47 = memref.load %arg2[%46] : memref<16xi32, #tpu.memory_space<smem>>
    %48 = arith.index_cast %47 : i32 to index
    %c0_12 = arith.constant 0 : index
    %49 = vector.load %arg3[%48, %c0_12] : memref<64x32xf32, #tpu.memory_space<vmem>>, vector<1x32xf32>
    %50 = arith.index_cast %c6_i32 : i32 to index
    %c0_13 = arith.constant 0 : index
    %51 = vector.load %arg6[%50, %c0_13] : memref<8x32xf32, #tpu.memory_space<vmem>>, vector<1x32xf32>
    tpu.vector_store %arg6[%50, %c0_13], %49 {strides = array<i32>} : memref<8x32xf32, #tpu.memory_space<vmem>>, vector<1x32xf32>,
    %c7_i32 = arith.constant 7 : i32
    %52 = arith.addi %2, %c7_i32 : i32
    %53 = arith.index_cast %52 : i32 to index
    %54 = memref.load %arg2[%53] : memref<16xi32, #tpu.memory_space<smem>>
    %55 = arith.index_cast %54 : i32 to index
    %c0_14 = arith.constant 0 : index
    %56 = vector.load %arg3[%55, %c0_14] : memref<64x32xf32, #tpu.memory_space<vmem>>, vector<1x32xf32>
    %57 = arith.index_cast %c7_i32 : i32 to index
    %c0_15 = arith.constant 0 : index
    %58 = vector.load %arg6[%57, %c0_15] : memref<8x32xf32, #tpu.memory_space<vmem>>, vector<1x32xf32>
    tpu.vector_store %arg6[%57, %c0_15], %56 {strides = array<i32>} : memref<8x32xf32, #tpu.memory_space<vmem>>, vector<1x32xf32>,
    %c8_i32_16 = arith.constant 8 : i32
    %c0_17 = arith.constant 0 : index
    %c0_18 = arith.constant 0 : index
    %59 = vector.load %arg6[%c0_17, %c0_18] : memref<8x32xf32, #tpu.memory_space<vmem>>, vector<8x32xf32>
    %cst = arith.constant 5.65685415 : f32
    %60 = vector.broadcast %cst : f32 to vector<8x32xf32>
    %61 = arith.mulf %59, %60 : vector<8x32xf32>
    %c0_19 = arith.constant 0 : index
    %c0_20 = arith.constant 0 : index
    %62 = vector.load %arg4[%c0_19, %c0_20] : memref<8x32xf32, #tpu.memory_space<vmem>>, vector<8x32xf32>
    %63 = arith.addf %61, %62 : vector<8x32xf32>
    %c0_21 = arith.constant 0 : index
    %c0_22 = arith.constant 0 : index
    %c0_23 = arith.constant 0 : index
    %64 = vector.load %arg5[%c0_21, %c0_22, %c0_23] : memref<1x8x32xf32, #tpu.memory_space<vmem>>, vector<1x8x32xf32>
    %65 = vector.shape_cast %64 : vector<1x8x32xf32> to vector<8x32xf32>
    %66 = vector.shape_cast %63 : vector<8x32xf32> to vector<1x8x32xf32>
    tpu.vector_store %arg5[%c0_21, %c0_22, %c0_23], %66 {strides = array<i32>} : memref<1x8x32xf32, #tpu.memory_space<vmem>>, vector<1x8x32xf32>,
    return
  }
  func.func @transform_0(%arg0: i32, %arg1: i32, %arg2: memref<16xi32, #tpu.memory_space<smem>>) -> (i32, i32) {
    %c0_i32 = arith.constant 0 : i32
    %c0_i32_0 = arith.constant 0 : i32
    %c0_i32_1 = arith.constant 0 : i32
    return %c0_i32, %c0_i32_0 : i32, i32
  }
  func.func @transform_1(%arg0: i32, %arg1: i32, %arg2: memref<16xi32, #tpu.memory_space<smem>>) -> (i32, i32) {
    %c0_i32 = arith.constant 0 : i32
    %c0_i32_0 = arith.constant 0 : i32
    return %arg0, %c0_i32 : i32, i32
  }
  func.func @transform_2(%arg0: i32, %arg1: i32, %arg2: memref<16xi32, #tpu.memory_space<smem>>) -> (i32, i32, i32) {
    %c0_i32 = arith.constant 0 : i32
    %c0_i32_0 = arith.constant 0 : i32
    return %arg1, %arg0, %c0_i32 : i32, i32, i32
  }
}

</mosaic_0001>

<bundles_post_ra>
// kernel: tpu_custom_call.1
= control target key start
LH: loop header
LB: loop body
LE: loop exit
PB: predicated region body
PF: predicated region fallthrough
CT: control target
= control target key end

     0   :  { %s623_s0 = inlined_call_operand.vmem [shape: s32[16], index: 0, kind: input, shape index: {}]   ;;  %s624_s1 = inlined_call_operand.vmem [shape: f32[64,32], index: 1, kind: input, shape index: {}]   ;;  %s625_s2 = inlined_call_operand.vmem [shape: f32[2048,32], index: 2, kind: input, shape index: {}]   ;;  %s626_s3 = inlined_call_operand.hbm [shape: f32[2,8,32], index: 3, kind: output, shape index: {}]  }
   0x1   :  { %s8_s14 = sshll.u32 %s623_s0, 4  ;;  %s9_s14 = int_to_ptr.vmem [resolvable:$true] %s8_s14 }
   0x2   :  { %s370_s15 = scalar_lea.vmem %s9_s14, 16  ;;  %p375_p1 = scmp.lt.s32.totalorder %s9_s14, %s9_s14 }
   0x3   :  { %p371_p0 = scmp.ne.s32.totalorder %s9_s14, %s370_s15  ;;  %p376_p2 = scmp.lt.s32.totalorder %s370_s15, %s370_s15 }
   0x5   :  { %p377_p3 = por %p376_p2, %p375_p1 }
   0x7   :  { %p378_p4 = pnand %p377_p3, %p371_p0 }
   0x9   :  { %381 = shalt.err (!%p378_p4)  }
   0xa   :  { %s462_s16 = smov [#allocation4]  }
   0xb   :  { %11 = dma.vmem_to_smem %s9_s14, 16, %s462_s16, [#allocation3] }
   0xc   :  { %432 = dma.done.wait [#allocation3], 16 }
   0xd   :  { %433 = vsyncadd [#allocation3], 4294967280 }
   0xe   :  { %13 = sfence }
   0xf   :  { %14 = vsyncpa [#allocation6], 0 }
  0x10   :  { %16 = vsyncpa [#allocation6 + $0x1], 0  ;;  %s487_s17 = smov 0   ;;  %s489_s18 = smov 0  }
  0x11   :  { %s491_s0 = smov 0   ;;  %s493_s19 = smov 0  }
  0x12   :  { %s495_s20 = smov 0   ;;  %s497_s21 = smov 0  }
  0x13 LB: > { %629 = sst [smem:[#allocation9_spill]] %s456_s20  ;;  %s303_s22 = sadd.s32 4294967295, %s460_s21   ;;  %s460_s21 = sphi %s497_s21, %s22_s21   ;;  %s456_s20 = sphi %s495_s20, %s634_s20   ;;  %s452_s19 = sphi %s493_s19, %s633_s19   ;;  %s448_s0 = sphi %s491_s0, %s637_s0   ;;  %s444_s18 = sphi %s489_s18, %s636_s18   ;;  %s440_s17 = sphi %s487_s17, %s635_s17  }
  0x14   : > { %s304_s23 = sadd.s32 4294967294, %s460_s21   ;;  %s31_s24 = sadd.s32 1, %s456_s20 }
  0x15   : > { %s90_s25 = sadd.s32 1, %s448_s0  ;;  %p32_p5 = scmp.ge.s32.totalorder %s31_s24, 2 }
  0x16   : > { %p100_p6 = scmp.ne.s32.totalorder %s448_s0, %s444_s18  ;;  %p101_p7 = scmp.eq.s32.totalorder %s303_s22, 1 }
  0x17   : > { %p106_p8 = scmp.ne.s32.totalorder %s444_s18, %s440_s17  ;;  %s639_s24 = smov (%p32_p5, %s31_s24), 0 }
  0x18   : > { %630 = sst [smem:[#allocation10_spill]] %s639_s24  ;;  %p527_p9 = por %p101_p7, %p100_p6 }
  0x19   : > { %p107_p10 = scmp.eq.s32.totalorder %s304_s23, 1  ;;  %s85_s27 = ssub.s32 %s456_s20, %s639_s24 }
  0x1a   : > { %p307_p11 = scmp.ge.s32.totalorder %s460_s21, 1  ;;  %p88_p12 = scmp.eq.s32.totalorder %s85_s27, 0 }
  0x1b   : > { %p534_p13 = por %p107_p10, %p106_p8  ;;  %p135_p0 = scmp.lt.s32.totalorder %s460_s21, 3 }
  0x1c   : > { %s540_s29 = scalar_select %p88_p12, %s448_s0, %s90_s25  }
  0x1d   : > { %p136_p1 = pnand %p307_p11, %p135_p0 }
  0x1e   : > { %s309_s30 = sshll.u32 (!%p136_p1), %s452_s19, 3 }
  0x1f   : > { %139 = sbr.rel (%p136_p1) target bundleno = 72 (0x48), region = 28  ;;  %s163_s4 = sld [smem:[#allocation4 + %s309_s30]] (!%p136_p1) }
  0x20   : > { %s168_s5 = sadd.s32 (!%p136_p1), 1, %s309_s30  ;;  %s173_s7 = sadd.s32 (!%p136_p1), 2, %s309_s30 }
  0x21   : > { %s169_s6 = sld [smem:[#allocation4 + %s168_s5]] (!%p136_p1)  ;;  %s178_s9 = sadd.s32 (!%p136_p1), 3, %s309_s30 }
  0x22   : > { %s174_s8 = sld [smem:[#allocation4 + %s173_s7]] (!%p136_p1)  ;;  %s183_s11 = sadd.s32 (!%p136_p1), 4, %s309_s30 }
  0x23   : > { %s179_s10 = sld [smem:[#allocation4 + %s178_s9]] (!%p136_p1)  ;;  %s188_s13 = sadd.s32 (!%p136_p1), 5, %s309_s30 }
  0x24   : > { %s184_s12 = sld [smem:[#allocation4 + %s183_s11]]  ;;  %vm166_vm0 = vcmask 253952   ;;  %s193_s15 = sadd.s32 6, %s309_s30  ;;  %v205_v9 = vld [vmem:[%s625_s2] sm:$0xff]  ;;  %vm207_vm1 = vcmask 261120  }
  0x25   : > { %s189_s14 = sld [smem:[#allocation4 + %s188_s13]]  ;;  %s164_s23 = scalar_lea.vmem %s624_s1, %s163_s4 }
  0x26   : > { %s194_s25 = sld [smem:[#allocation4 + %s193_s15]]  ;;  %v165_v0 = vld [vmem:[%s164_s23] sm:$0x1]  ;;  %s198_s20 = sadd.s32 7, %s309_s30 }
  0x27   : > { %s170_s5 = scalar_lea.vmem %s624_s1, %s169_s6  ;;  %167 = vst.msk [vmem:[#allocation2] sm:$0x1] %vm166_vm0, %v165_v0  ;;  %s199_s13 = sld [smem:[#allocation4 + %s198_s20]] }
  0x28   : > { %v171_v1 = vld [vmem:[%s170_s5] sm:$0x1]  ;;  %s175_s11 = scalar_lea.vmem %s624_s1, %s174_s8  ;;  %s153_s5 = sand.u32 1, %s444_s18  }
  0x29   : > { %172 = vst.msk [vmem:[#allocation2 + $0x1] sm:$0x1] %vm166_vm0, %v171_v1  ;;  %v176_v2 = vld [vmem:[%s175_s11] sm:$0x1]  ;;  %s180_s16 = scalar_lea.vmem %s624_s1, %s179_s10 }
  0x2a   : > { %177 = vst.msk [vmem:[#allocation2 + $0x2] sm:$0x1] %vm166_vm0, %v176_v2  ;;  %v181_v3 = vld [vmem:[%s180_s16] sm:$0x1]  ;;  %s185_s6 = scalar_lea.vmem %s624_s1, %s184_s12  ;;  %s311_s16 = sshll.u32 %s452_s19, 7 }
  0x2b   : > { %182 = vst.msk [vmem:[#allocation2 + $0x3] sm:$0x1] %vm166_vm0, %v181_v3  ;;  %v186_v4 = vld [vmem:[%s185_s6] sm:$0x1]  ;;  %s190_s20 = scalar_lea.vmem %s624_s1, %s189_s14  ;;  %s308_s14 = sshll.u32 %s153_s5, 3 }
  0x2c   : > { %187 = vst.msk [vmem:[#allocation2 + $0x4] sm:$0x1] %vm166_vm0, %v186_v4  ;;  %v191_v5 = vld [vmem:[%s190_s20] sm:$0x1]  ;;  %s195_s27 = scalar_lea.vmem %s624_s1, %s194_s25  ;;  %s155_s11 = scalar_lea.vmem [#allocation5], %s308_s14 }
  0x2d   : > { %192 = vst.msk [vmem:[#allocation2 + $0x5] sm:$0x1] %vm166_vm0, %v191_v5  ;;  %v196_v6 = vld [vmem:[%s195_s27] sm:$0x1]  ;;  %s200_s9 = scalar_lea.vmem %s624_s1, %s199_s13  ;;  %s224_s4 = sshll.u32 %s155_s11, 4  ;;  %s580_s4 = int_to_ptr.vmem [resolvable:$true] %s224_s4 }
  0x2e   : > { %197 = vst.msk [vmem:[#allocation2 + $0x6] sm:$0x1] %vm166_vm0, %v196_v6  ;;  %v201_v7 = vld [vmem:[%s200_s9] sm:$0x1]  ;;  %s222_s30 = scalar_lea.hbm %s626_s3, %s311_s16  ;;  %s210_s6 = scalar_lea.sflag [#allocation6], %s153_s5 }
  0x2f   : > { %202 = vst.msk [vmem:[#allocation2 + $0x7] sm:$0x1] %vm166_vm0, %v201_v7  ;;  %s382_s8 = scalar_lea.vmem %s580_s4, 128  ;;  %s463_s19 = smov [#allocation5]  }
  0x30   : > { %p383_p2 = scmp.ne.s32.totalorder %s580_s4, %s382_s8  ;;  %s386_s22 = sshll.u32 %s463_s19, 4  ;;  %s387_s22 = int_to_ptr.vmem [resolvable:$false] %s386_s22 }
  0x31   : > { %s388_s20 = scalar_lea.vmem %s387_s22, 256  ;;  %p389_p5 = scmp.lt.s32.totalorder %s580_s4, %s387_s22 }
  0x32   : > { %p384_p3 = pnand %p383_p2, %p527_p9  ;;  %p390_p6 = scmp.lt.s32.totalorder %s388_s20, %s382_s8 }
  0x34   : > { %p385_p4 = pneg %p384_p3  ;;  %p391_p7 = por %p390_p6, %p389_p5 }
  0x36   : > { %v203_v8 = vld [vmem:[#allocation2] sm:$0xff]  ;;  %p392_p8 = pnand %p391_p7, %p385_p4 }
  0x37   : > { %v204_v10 = vmul.f32 5.656854, %v203_v8 }
  0x39   : > { %v206_v11 = vadd.f32 %v205_v9, %v204_v10 }
  0x3b   : > { %208 = vst.msk [vmem:[%s155_s11] sm:$0xff] %vm207_vm1, %v206_v11 }
  0x3c   : > { %395 = shalt.err (!%p392_p8)
}
  0x3d   : > { %s396_s23 = scalar_lea.hbm %s222_s30, 128  ;;  %s400_s5 = scalar_lea.hbm %s626_s3, 256 }
  0x3e   : > { %p397_p10 = scmp.ne.s32.totalorder %s222_s30, %s396_s23  ;;  %p401_p0 = scmp.lt.s32.totalorder %s222_s30, %s626_s3 }
  0x3f   : > { %p402_p1 = scmp.lt.s32.totalorder %s400_s5, %s396_s23 }
  0x40   : > { %p398_p11 = pnand %p397_p10, %p527_p9 }
  0x41   : > { %p403_p2 = por %p402_p1, %p401_p0 }
  0x42   : > { %p399_p12 = pneg %p398_p11 }
  0x44   : > { %p404_p3 = pnand %p403_p2, %p399_p12 }
  0x46   : > { %407 = shalt.err (!%p404_p3)
}
  0x47   : > { %314 = dma.vmem_to_hbm [thread:$0]  (%p527_p9), %s580_s4, 128, %s222_s30, %s210_s6  }
  0x48 PF: > { %p320_p4 = scmp.ge.s32.totalorder %s460_s21, 2  ;;  %s236_s9 = sand.u32 1, %s440_s17  }
  0x49   : > { %s237_s14 = scalar_lea.sflag [#allocation6], %s236_s9 }
  0x4a   : > { %p317_p5 = pnand %p320_p4, %p534_p13 }
  0x4c   : > { %p318_p6 = pneg %p317_p5 }
  0x4e   : > { %435 = dma.done.wait (%p318_p6), %s237_s14, 128  }
  0x4f   : > { %437 = vsyncadd (%p318_p6), %s237_s14, 4294967168  ;;  %s22_s21 = sadd.s32 1, %s460_s21   ;;  %s633_s19 = sld [smem:[#allocation9_spill]] }
  0x50   : > { %p19_p7 = scmp.ge.s32.totalorder %s22_s21, 4   ;;  %s634_s20 = sld [smem:[#allocation10_spill]] }
  0x51   : > { %s635_s17 = smov %s444_s18  ;;  %s636_s18 = smov %s448_s0 }
  0x52   : > { %s637_s0 = smov %s540_s29  ;;  %21 = sbr.rel (!%p19_p7) target bundleno = 19 (0x13), region = 71 }
  0x57   :  { %242 = vsyncpa [#allocation6], 1 }
  0x58   :  { %244 = vsyncpa [#allocation6 + $0x1], 1 }

</bundles_post_ra>
